<compile_context>
chip_gen: v6e
topology: v6e:2x2x1
jax: 0.10.0
libtpu: 0.0.40
codegen_flags: <defaults>
</compile_context>

<pallas_src>
import functools

import jax
import jax.numpy as jnp
from jax.experimental import pallas as pl
from jax.experimental.pallas import tpu as pltpu

EPS = 1e-5  # PyTorch BatchNorm default eps


def _round_up(x, m):
    return (x + m - 1) // m * m


def _pick_tile(dim, pref, unit=128):
    """Largest multiple of `unit` <= min(pref, dim) that divides dim (dim % unit == 0)."""
    t = max(unit, min(pref, dim) // unit * unit)
    while dim % t:
        t -= unit
    return t


def _default_tn():
    # v5e MXU is 4x128^2 (and has the tightest VMEM / single vst slot) -> tn=128;
    # v6e / v7x MXUs are 256-wide -> tn=256.
    try:
        kind = jax.devices()[0].device_kind.lower()
    except Exception:
        kind = ""
    return 128 if "v5" in kind else 256


def _sigmoid_f32(y):
    # exp goes to the EUP; approx reciprocal also uses the EUP slot (off the VALU path).
    return pl.reciprocal(1.0 + jnp.exp(-y), approx=True)


# --------------------------------------------------------------------------------------
# Pallas kernels: out = silu((A @ B) * scale + shift)
# --------------------------------------------------------------------------------------
def _mm_bn_silu_kernel_1k(a_ref, b_ref, scale_ref, shift_ref, o_ref):
    """Whole K reduction in one dot: no accumulator, no init, output stored exactly once."""
    y = jnp.dot(a_ref[...], b_ref[...], preferred_element_type=jnp.float32)
    y = y * scale_ref[...] + shift_ref[...]            # folded BatchNorm (+ conv bias)
    o_ref[...] = (y * _sigmoid_f32(y)).astype(o_ref.dtype)


def _mm_bn_silu_kernel_multik(a_ref, b_ref, scale_ref, shift_ref, o_ref, acc_ref):
    """Fallback for very large K: f32 scratch accumulator, last accumulate fused with epilogue."""
    k = pl.program_id(2)
    nk = pl.num_programs(2)

    part = jnp.dot(a_ref[...], b_ref[...], preferred_element_type=jnp.float32)

    @pl.when(k == 0)
    def _():
        acc_ref[...] = part

    @pl.when(jnp.logical_and(k > 0, k < nk - 1))
    def _():
        acc_ref[...] += part

    @pl.when(k == nk - 1)
    def _():
        y = acc_ref[...] + part                         # fused last accumulate + epilogue
        y = y * scale_ref[...] + shift_ref[...]
        o_ref[...] = (y * _sigmoid_f32(y)).astype(o_ref.dtype)


def fused_matmul_bn_silu(a_bf16, w_bf16, scale, shift, *, tm, tn=None, max_tk=2048,
                         out_dtype=jnp.float32):
    """(Mp, Kp) bf16 @ (Kp, Np) bf16 with per-column f32 affine + SiLU.

    Requires Mp % tm == 0, Kp % 128 == 0, Np % 128 == 0.
    out_dtype=jnp.bfloat16 halves HBM writeback if downstream tolerates it (default f32
    to match the PyTorch module's output dtype).
    """
    Mp, Kp = a_bf16.shape
    Kp2, Np = w_bf16.shape
    assert Kp == Kp2 and Mp % tm == 0 and Kp % 128 == 0 and Np % 128 == 0
    if tn is None:
        tn = _default_tn()
    tn = _pick_tile(Np, tn)
    tk = _pick_tile(Kp, max_tk)
    mt, nt, kt = Mp // tm, Np // tn, Kp // tk

    if kt == 1:
        # Grid (M, N), both parallel (megacore split).  N innermost -> A block index is
        # constant across N (A streamed once); weight/scale/shift indexed only by n.
        return pl.pallas_call(
            _mm_bn_silu_kernel_1k,
            out_shape=jax.ShapeDtypeStruct((Mp, Np), out_dtype),
            grid_spec=pltpu.PrefetchScalarGridSpec(
                num_scalar_prefetch=0,
                grid=(mt, nt),
                in_specs=[
                    pl.BlockSpec((tm, Kp), lambda m, n: (m, 0)),
                    pl.BlockSpec((Kp, tn), lambda m, n: (0, n)),   # VMEM-resident when nt==1
                    pl.BlockSpec((1, tn), lambda m, n: (0, n)),
                    pl.BlockSpec((1, tn), lambda m, n: (0, n)),
                ],
                out_specs=pl.BlockSpec((tm, tn), lambda m, n: (m, n)),
            ),
            compiler_params=pltpu.CompilerParams(
                dimension_semantics=("parallel", "parallel")),
        )(a_bf16, w_bf16, scale, shift)

    # Large-K fallback: reduction axis last ("arbitrary"), M/N parallel.
    return pl.pallas_call(
        _mm_bn_silu_kernel_multik,
        out_shape=jax.ShapeDtypeStruct((Mp, Np), out_dtype),
        grid_spec=pltpu.PrefetchScalarGridSpec(
            num_scalar_prefetch=0,
            grid=(mt, nt, kt),
            in_specs=[
                pl.BlockSpec((tm, tk), lambda m, n, k: (m, k)),
                pl.BlockSpec((tk, tn), lambda m, n, k: (k, n)),
                pl.BlockSpec((1, tn), lambda m, n, k: (0, n)),
                pl.BlockSpec((1, tn), lambda m, n, k: (0, n)),
            ],
            out_specs=pl.BlockSpec((tm, tn), lambda m, n, k: (m, n)),
            scratch_shapes=[pltpu.VMEM((tm, tn), jnp.float32)],
        ),
        compiler_params=pltpu.CompilerParams(
            dimension_semantics=("parallel", "parallel", "arbitrary")),
    )(a_bf16, w_bf16, scale, shift)


# --------------------------------------------------------------------------------------
# JAX glue: im2col patch extraction + one-time weight/BN preparation.
# --------------------------------------------------------------------------------------
def extract_patches_2d(x, kh, kw, stride, padding):
    """x: (B, C, H, W) -> (B*Ho*Wo, kh*kw*C) with K ordered (kh, kw, C)."""
    xp = jnp.pad(x, ((0, 0), (0, 0), (padding, padding), (padding, padding)))
    B, C, Hp, Wp = xp.shape
    Ho = (Hp - kh) // stride + 1
    Wo = (Wp - kw) // stride + 1
    pats = []
    for a in range(kh):
        for b in range(kw):
            pats.append(xp[:, :, a:a + Ho * stride:stride, b:b + Wo * stride:stride])
    p = jnp.stack(pats, axis=1)                 # (B, kh*kw, C, Ho, Wo)
    p = jnp.transpose(p, (0, 3, 4, 1, 2))       # (B, Ho, Wo, kh*kw, C)
    return p.reshape(B * Ho * Wo, kh * kw * C), (B, Ho, Wo)


def prepare_params(raw):
    """One-time (outside the traced forward): fold BN, im2col-transpose, pad K/N to 128, cast bf16."""
    cout, cin, kh, kw = raw["w"].shape
    K = cin * kh * kw
    N = cout
    Kp = _round_up(K, 128)
    Np = _round_up(N, 128)
    # im2col weight: rows ordered (kh, kw, cin) to match extract_patches_2d.
    w2 = jnp.transpose(raw["w"], (2, 3, 1, 0)).reshape(K, N)
    w2 = jnp.pad(w2, ((0, Kp - K), (0, Np - N))).astype(jnp.bfloat16)
    inv = 1.0 / jnp.sqrt(raw["var"] + EPS)
    scale = raw["gamma"] * inv
    shift = (raw["b"] - raw["mean"]) * scale + raw["beta"]   # conv bias folded into BN shift
    scale = jnp.pad(scale, (0, Np - N)).reshape(1, Np).astype(jnp.float32)
    shift = jnp.pad(shift, (0, Np - N)).reshape(1, Np).astype(jnp.float32)
    return dict(w2=w2, scale=scale, shift=shift)


def my_conv2d_forward(prep, x, *, kernel, stride, padding, K, N, tm_pref=512):
    """MyConv2d eval forward: Conv2d -> BatchNorm2d (running stats) -> SiLU -> Dropout(identity)."""
    # TODO(synk): fuse im2col + the NCHW<->NHWC transposes into the Pallas kernel (index_map
    # over (b, ho, wo) row blocks / manual DMA gather) to remove these wrapper-side HBM passes.
    x_bf = x.astype(jnp.bfloat16)               # halve im2col / HBM traffic; MXU-native dtype
    patches, (B, Ho, Wo) = extract_patches_2d(x_bf, kernel, kernel, stride, padding)
    M = patches.shape[0]
    Kp = prep["w2"].shape[0]
    tm = min(tm_pref, _round_up(M, 16))         # multiple of 16: bf16 packs 2 rows / sublane
    Mp = _round_up(M, tm)
    patches = jnp.pad(patches, ((0, Mp - M), (0, Kp - K)))   # zero K-pad: matmul unchanged
    y = fused_matmul_bn_silu(patches, prep["w2"], prep["scale"], prep["shift"], tm=tm)
    y = y[:M, :N].reshape(B, Ho, Wo, N)
    return jnp.transpose(y, (0, 3, 1, 2))       # back to NCHW
    # Dropout(p=0.1) is identity in eval mode -> no op emitted.


# --------------------------------------------------------------------------------------
# Deterministic synthetic parameters (matches shapes of MyConv2d.__init__) + reference.
# --------------------------------------------------------------------------------------
def init_raw_params(key, cin, cout, kernel):
    ks = jax.random.split(key, 6)
    return dict(
        w=0.05 * jax.random.normal(ks[0], (cout, cin, kernel, kernel), jnp.float32),
        b=0.05 * jax.random.normal(ks[1], (cout,), jnp.float32),
        gamma=1.0 + 0.1 * jax.random.normal(ks[2], (cout,), jnp.float32),
        beta=0.05 * jax.random.normal(ks[3], (cout,), jnp.float32),
        mean=0.05 * jax.random.normal(ks[4], (cout,), jnp.float32),
        var=1.0 + 0.1 * jnp.abs(jax.random.normal(ks[5], (cout,), jnp.float32)),
    )


def reference_forward(raw, x, stride, padding):
    y = jax.lax.conv_general_dilated(
        x, raw["w"], window_strides=(stride, stride),
        padding=[(padding, padding), (padding, padding)],
        dimension_numbers=("NCHW", "OIHW", "NCHW"))
    y = y + raw["b"][None, :, None, None]
    inv = 1.0 / jnp.sqrt(raw["var"] + EPS)
    y = (y - raw["mean"][None, :, None, None]) * (raw["gamma"] * inv)[None, :, None, None] \
        + raw["beta"][None, :, None, None]
    return y * jax.nn.sigmoid(y)


# --------------------------------------------------------------------------------------
if __name__ == "__main__":
    key = jax.random.PRNGKey(0)
    k_params, k_x = jax.random.split(key)

    B, Cin, Cout, H, W = 2, 4, 64, 16, 16
    kernel, stride, padding = 3, 2, 1

    raw = init_raw_params(k_params, Cin, Cout, kernel)
    prep = prepare_params(raw)                   # weight prep once, outside the traced forward
    x = jax.random.normal(k_x, (B, Cin, H, W), jnp.float32)

    K = Cin * kernel * kernel
    fwd = jax.jit(functools.partial(my_conv2d_forward,
                                    kernel=kernel, stride=stride, padding=padding,
                                    K=K, N=Cout))
    out = jax.block_until_ready(fwd(prep, x))

    Ho = (H + 2 * padding - kernel) // stride + 1
    Wo = (W + 2 * padding - kernel) // stride + 1
    assert out.shape == (B, Cout, Ho, Wo), out.shape
    assert bool(jnp.all(jnp.isfinite(out)))

    ref = reference_forward(raw, x, stride, padding)
    max_err = float(jnp.max(jnp.abs(out - ref)))
    assert max_err < 6e-2, max_err               # bf16-matmul tolerance vs f32 reference
    print("KERNEL_OK")
</pallas_src>

<mosaic_0001>
module attributes {stable_mosaic.version = 11 : i64} {
  func.func @_mm_bn_silu_kernel_1k(%arg0: i32, %arg1: i32, %arg2: memref<128x128xbf16, #tpu.memory_space<vmem>>, %arg3: memref<128x128xbf16, #tpu.memory_space<vmem>>, %arg4: memref<1x128xf32, #tpu.memory_space<vmem>>, %arg5: memref<1x128xf32, #tpu.memory_space<vmem>>, %arg6: memref<128x128xf32, #tpu.memory_space<vmem>>) attributes {dimension_semantics = [#tpu.dimension_semantics<parallel>, #tpu.dimension_semantics<parallel>], iteration_bounds = array<i64: 1, 1>, scalar_prefetch = 0 : i64, scratch_operands = 0 : i64, tpu.core_type = #tpu.core_type<tc>, window_params = [{transform_indices = @transform_0, window_bounds = array<i64: 128, 128>}, {transform_indices = @transform_1, window_bounds = array<i64: 128, 128>}, {transform_indices = @transform_2, window_bounds = array<i64: 1, 128>}, {transform_indices = @transform_3, window_bounds = array<i64: 1, 128>}, {transform_indices = @transform_4, window_bounds = array<i64: 128, 128>}]} {
    %c0 = arith.constant 0 : index
    %c0_0 = arith.constant 0 : index
    %0 = vector.load %arg2[%c0, %c0_0] : memref<128x128xbf16, #tpu.memory_space<vmem>>, vector<128x128xbf16>
    %c0_1 = arith.constant 0 : index
    %c0_2 = arith.constant 0 : index
    %1 = vector.load %arg3[%c0_1, %c0_2] : memref<128x128xbf16, #tpu.memory_space<vmem>>, vector<128x128xbf16>
    %cst = arith.constant dense<0.000000e+00> : vector<128x128xf32>
    %2 = tpu.matmul %0, %1, %cst {dimension_numbers = #tpu.dot_dimension_numbers<[1], [0], [0], [1], [0, 0, 1, 1], [], []>} : vector<128x128xbf16>, vector<128x128xbf16>, vector<128x128xf32> -> vector<128x128xf32>
    %c0_3 = arith.constant 0 : index
    %c0_4 = arith.constant 0 : index
    %3 = vector.load %arg4[%c0_3, %c0_4] : memref<1x128xf32, #tpu.memory_space<vmem>>, vector<1x128xf32>
    %4 = vector.broadcast %3 : vector<1x128xf32> to vector<128x128xf32>
    %5 = arith.mulf %2, %4 : vector<128x128xf32>
    %c0_5 = arith.constant 0 : index
    %c0_6 = arith.constant 0 : index
    %6 = vector.load %arg5[%c0_5, %c0_6] : memref<1x128xf32, #tpu.memory_space<vmem>>, vector<1x128xf32>
    %7 = vector.broadcast %6 : vector<1x128xf32> to vector<128x128xf32>
    %8 = arith.addf %5, %7 : vector<128x128xf32>
    %cst_7 = arith.constant 0.000000e+00 : f32
    %9 = vector.broadcast %cst_7 : f32 to vector<128x128xf32>
    %10 = arith.subf %9, %8 : vector<128x128xf32>
    %11 = math.exp %10 : vector<128x128xf32>
    %cst_8 = arith.constant 1.000000e+00 : f32
    %12 = vector.broadcast %cst_8 : f32 to vector<128x128xf32>
    %13 = arith.addf %12, %11 : vector<128x128xf32>
    %14 = tpu.reciprocal %13 {approx = true} : vector<128x128xf32> -> vector<128x128xf32>
    %15 = arith.mulf %8, %14 : vector<128x128xf32>
    %c0_9 = arith.constant 0 : index
    %c0_10 = arith.constant 0 : index
    %16 = vector.load %arg6[%c0_9, %c0_10] : memref<128x128xf32, #tpu.memory_space<vmem>>, vector<128x128xf32>
    tpu.vector_store %arg6[%c0_9, %c0_10], %15 {strides = array<i32>} : memref<128x128xf32, #tpu.memory_space<vmem>>, vector<128x128xf32>,
    return
  }
  func.func @transform_0(%arg0: i32, %arg1: i32) -> (i32, i32) {
    %c0_i32 = arith.constant 0 : i32
    %c0_i32_0 = arith.constant 0 : i32
    return %arg0, %c0_i32 : i32, i32
  }
  func.func @transform_1(%arg0: i32, %arg1: i32) -> (i32, i32) {
    %c0_i32 = arith.constant 0 : i32
    %c0_i32_0 = arith.constant 0 : i32
    return %c0_i32, %arg1 : i32, i32
  }
  func.func @transform_2(%arg0: i32, %arg1: i32) -> (i32, i32) {
    %c0_i32 = arith.constant 0 : i32
    %c0_i32_0 = arith.constant 0 : i32
    return %c0_i32, %arg1 : i32, i32
  }
  func.func @transform_3(%arg0: i32, %arg1: i32) -> (i32, i32) {
    %c0_i32 = arith.constant 0 : i32
    %c0_i32_0 = arith.constant 0 : i32
    return %c0_i32, %arg1 : i32, i32
  }
  func.func @transform_4(%arg0: i32, %arg1: i32) -> (i32, i32) {
    %c0_i32 = arith.constant 0 : i32
    return %arg0, %arg1 : i32, i32
  }
}

</mosaic_0001>

<bundles_post_ra>
// kernel: my_conv2d_forward.1
= control target key start
LH: loop header
LB: loop body
LE: loop exit
PB: predicated region body
PF: predicated region fallthrough
CT: control target
= control target key end

     0   :  { %s790_s0 = inlined_call_operand.vmem [shape: bf16[128,128], index: 0, kind: input, shape index: {}]   ;;  %s791_s1 = inlined_call_operand.vmem [shape: bf16[128,128], index: 1, kind: input, shape index: {}]   ;;  %s792_s2 = inlined_call_operand.vmem [shape: f32[1,128], index: 2, kind: input, shape index: {}]   ;;  %s793_s3 = inlined_call_operand.vmem [shape: f32[1,128], index: 3, kind: input, shape index: {}]   ;;  %s794_s4 = inlined_call_operand.hbm [shape: f32[128,128], index: 4, kind: output, shape index: {}]  }
   0x1   :  { %v503_v0 = vld [vmem:[%s791_s1 + $0x38] sm:$0xff]   ;;  %v504_v1 = vld [vmem:[%s791_s1 + $0x30] sm:$0xff]   ;;  %v505_v2 = vld [vmem:[%s791_s1 + $0x28] sm:$0xff]  }
   0x2   :  { %452 = vmatprep.subr.bf16.mxu0 %v503_v0  ;;  %484 = vmatprep.subr.bf16.mxu1 %v503_v0  ;;  %v506_v3 = vld [vmem:[%s791_s1 + $0x20] sm:$0xff]   ;;  %v507_v6 = vld [vmem:[%s791_s1 + $0x18] sm:$0xff]   ;;  %v508_v7 = vld [vmem:[%s791_s1 + $0x10] sm:$0xff]  }
   0x3   :  { %453 = vmatpush3.bf16.msra.mxu0 %v503_v0  ;;  %492 = vmatpush3.bf16.msra.mxu1 %v503_v0  ;;  %v511_v4 = vld [vmem:[%s790_s0] sm:$0xff]  }
   0x4   :  { %454 = vmatprep.subr.bf16.mxu0 %v504_v1  ;;  %485 = vmatprep.subr.bf16.mxu1 %v504_v1  ;;  %v512_v5 = vld [vmem:[%s790_s0 + $0x20] sm:$0xff]  }
   0x5   :  { %468 = vmatprep.mubr.bf16.mxu0 %v511_v4  ;;  %476 = vmatprep.mubr.bf16.mxu1 %v512_v5 }
   0x7   :  { %455 = vmatpush3.bf16.msra.mxu0 %v504_v1  ;;  %493 = vmatpush3.bf16.msra.mxu1 %v504_v1 }
   0x8   :  { %456 = vmatprep.subr.bf16.mxu0 %v505_v2  ;;  %486 = vmatprep.subr.bf16.mxu1 %v505_v2 }
   0xb   :  { %457 = vmatpush3.bf16.msra.mxu0 %v505_v2  ;;  %494 = vmatpush3.bf16.msra.mxu1 %v505_v2 }
   0xc   :  { %458 = vmatprep.subr.bf16.mxu0 %v506_v3  ;;  %487 = vmatprep.subr.bf16.mxu1 %v506_v3 }
   0xf   :  { %459 = vmatpush3.bf16.msra.mxu0 %v506_v3  ;;  %495 = vmatpush3.bf16.msra.mxu1 %v506_v3 }
  0x10   :  { %460 = vmatprep.subr.bf16.mxu0 %v507_v6  ;;  %488 = vmatprep.subr.bf16.mxu1 %v507_v6 }
  0x11   :  { %9 = vsyncpa [#allocation3], 0  ;;  %v509_v8 = vld [vmem:[%s791_s1 + $0x8] sm:$0xff]   ;;  %v510_v9 = vld [vmem:[%s791_s1] sm:$0xff]  }
  0x12   :  { %v513_v10 = vld [vmem:[%s790_s0 + $0x8] sm:$0xff]   ;;  %v515_v12 = vld [vmem:[%s790_s0 + $0x10] sm:$0xff]   ;;  %v517_v14 = vld [vmem:[%s790_s0 + $0x18] sm:$0xff]  }
  0x13   :  { %461 = vmatpush3.bf16.msra.mxu0 %v507_v6  ;;  %496 = vmatpush3.bf16.msra.mxu1 %v507_v6  ;;  %v514_v11 = vld [vmem:[%s790_s0 + $0x28] sm:$0xff]   ;;  %v516_v13 = vld [vmem:[%s790_s0 + $0x30] sm:$0xff]   ;;  %v518_v15 = vld [vmem:[%s790_s0 + $0x38] sm:$0xff]   ;;  %s605_s0 = smov [#allocation2]  }
  0x14   :  { %462 = vmatprep.subr.bf16.mxu0 %v508_v7  ;;  %489 = vmatprep.subr.bf16.mxu1 %v508_v7  ;;  %v684_v16 = vld [vmem:[%s792_s2] ss:$0 sm:$0xff]  ;;  %s407_s2 = sshll.u32 %s605_s0, 4  ;;  %s408_s2 = int_to_ptr.vmem [resolvable:$true] %s407_s2 }
  0x15   :  { %v689_v18 = vld [vmem:[%s793_s3] ss:$0 sm:$0xff]  ;;  %s583_s3 = scalar_lea.vmem %s408_s2, 2048  ;;  %p588_p1 = scmp.lt.s32.totalorder %s408_s2, %s408_s2 }
  0x16   :  { %p584_p0 = scmp.ne.s32.totalorder %s408_s2, %s583_s3  ;;  %p589_p2 = scmp.lt.s32.totalorder %s583_s3, %s583_s3 }
  0x17   :  { %463 = vmatpush3.bf16.msra.mxu0 %v508_v7  ;;  %497 = vmatpush3.bf16.msra.mxu1 %v508_v7 }
  0x18   :  { %464 = vmatprep.subr.bf16.mxu0 %v509_v8  ;;  %490 = vmatprep.subr.bf16.mxu1 %v509_v8  ;;  %p590_p3 = por %p589_p2, %p588_p1 }
  0x1a   :  { %p591_p4 = pnand %p590_p3, %p584_p0 }
  0x1b   :  { %465 = vmatpush3.bf16.msra.mxu0 %v509_v8  ;;  %498 = vmatpush3.bf16.msra.mxu1 %v509_v8 }
  0x1c   :  { %466 = vmatprep.subr.bf16.mxu0 %v510_v9  ;;  %491 = vmatprep.subr.bf16.mxu1 %v510_v9 }
  0x1f   :  { %467 = vmatpush3.bf16.msra.mxu0 %v510_v9  ;;  %499 = vmatpush3.bf16.msra.mxu1 %v510_v9 }
  0x22   :  { %469 = vmatmul.mubr.bf16.vlgmr.msra.gmra.mxu0 %v513_v10  ;;  %477 = vmatmul.mubr.bf16.vlgmr.msra.gmra.mxu1 %v514_v11 }
  0x23   :  { %472 = vmatprep.mubr.bf16.mxu0 %v515_v12  ;;  %480 = vmatprep.mubr.bf16.mxu1 %v516_v13 }
  0x2a   :  { %473 = vmatmul.mubr.bf16.gmra.mxu0 %v517_v14  ;;  %481 = vmatmul.mubr.bf16.gmra.mxu1 %v518_v15 }
  0xe2   :  { %v470_v17 = vpop.f32.mrf.mxu0  ;;  %v478_v19 = vpop.f32.mrf.mxu1 }
  0xe3   :  { %v253_v20 = vmul.f32 %v470_v17, %v684_v16  ;;  %v261_v21 = vmul.f32 %v478_v19, %v684_v16 }
  0xe4   :  { %v181_v22 = vpop.f32.mrf.mxu0  ;;  %v213_v23 = vpop.f32.mrf.mxu1 }
  0xe5   :  { %v694_v24 = vadd.f32 %v689_v18, %v253_v20  ;;  %v697_v25 = vadd.f32 %v689_v18, %v261_v21  ;;  %v251_v26 = vmul.f32 %v684_v16, %v181_v22  ;;  %v259_v27 = vmul.f32 %v684_v16, %v213_v23 }
  0xe6   :  { %v471_v28 = vpop.f32.mrf.mxu0  ;;  %v479_v29 = vpop.f32.mrf.mxu1 }
  0xe7   :  { %v292_v30 = vsub.f32 0.0, %v694_v24  ;;  %v300_v31 = vsub.f32 0.0, %v697_v25  ;;  %v704_v32 = vadd.f32 %v689_v18, %v251_v26  ;;  %v707_v33 = vadd.f32 %v689_v18, %v259_v27 }
  0xe8   :  { %v254_v34 = vmul.f32 %v471_v28, %v684_v16  ;;  %v262_v35 = vmul.f32 %v479_v29, %v684_v16  ;;  %v184_v36 = vpop.f32.mrf.mxu0  ;;  %v216_v37 = vpop.f32.mrf.mxu1 }
  0xe9   :  { %v310_v38 = vmul.f32 1.442695, %v292_v30  ;;  %v326_v39 = vmul.f32 1.442695, %v300_v31  ;;  %v290_v40 = vsub.f32 0.0, %v704_v32  ;;  %v298_v41 = vsub.f32 0.0, %v707_v33 }
  0xea   :  { %v714_v42 = vadd.f32 %v689_v18, %v254_v34  ;;  %v717_v43 = vadd.f32 %v689_v18, %v262_v35  ;;  %v252_v44 = vmul.f32 %v684_v16, %v184_v36  ;;  %v260_v45 = vmul.f32 %v684_v16, %v216_v37  ;;  %v474_v46 = vpop.f32.mrf.mxu0  ;;  %v482_v47 = vpop.f32.mrf.mxu1 }
  0xeb   :  { %519 = vpow2.f32 %v310_v38  ;;  %v306_v48 = vmul.f32 1.442695, %v290_v40  ;;  %v322_v49 = vmul.f32 1.442695, %v298_v41  ;;  %v257_v50 = vmul.f32 %v474_v46, %v684_v16 }
  0xec   :  { %521 = vpow2.f32 %v326_v39  ;;  %v293_v51 = vsub.f32 0.0, %v714_v42  ;;  %v301_v52 = vsub.f32 0.0, %v717_v43  ;;  %v725_v53 = vadd.f32 %v689_v18, %v252_v44  ;;  %v197_v54 = vpop.f32.mrf.mxu0  ;;  %v229_v55 = vpop.f32.mrf.mxu1 }
  0xed   :  { %523 = vpow2.f32 %v306_v48  ;;  %v728_v56 = vadd.f32 %v689_v18, %v260_v45  ;;  %v731_v57 = vadd.f32 %v689_v18, %v257_v50  ;;  %v265_v58 = vmul.f32 %v482_v47, %v684_v16 }
  0xee   :  { %525 = vpow2.f32 %v322_v49  ;;  %v312_v59 = vmul.f32 1.442695, %v293_v51  ;;  %v328_v60 = vmul.f32 1.442695, %v301_v52  ;;  %v291_v61 = vsub.f32 0.0, %v725_v53  ;;  %v475_v62 = vpop.f32.mrf.mxu0  ;;  %v483_v6 = vpop.f32.mrf.mxu1 }
  0xef   :  { %v299_v63 = vsub.f32 0.0, %v728_v56  ;;  %v296_v0 = vsub.f32 0.0, %v731_v57  ;;  %v738_v1 = vadd.f32 %v689_v18, %v265_v58  ;;  %v255_v2 = vmul.f32 %v684_v16, %v197_v54 }
  0xf0   :  { %527 = vpow2.f32 %v312_v59  ;;  %v308_v3 = vmul.f32 1.442695, %v291_v61  ;;  %v263_v4 = vmul.f32 %v684_v16, %v229_v55  ;;  %v258_v5 = vmul.f32 %v475_v62, %v684_v16  ;;  %v200_v15 = vpop.f32.mrf.mxu0  ;;  %v232_v21 = vpop.f32.mrf.mxu1 }
  0xf1   :  { %529 = vpow2.f32 %v328_v60  ;;  %v324_v7 = vmul.f32 1.442695, %v299_v63  ;;  %v318_v8 = vmul.f32 1.442695, %v296_v0  ;;  %v304_v9 = vsub.f32 0.0, %v738_v1 }
  0xf2   :  { %531 = vpow2.f32 %v308_v3  ;;  %v745_v10 = vadd.f32 %v689_v18, %v255_v2  ;;  %v748_v11 = vadd.f32 %v689_v18, %v263_v4  ;;  %v751_v12 = vadd.f32 %v689_v18, %v258_v5 }
  0xf3   :  { %533 = vpow2.f32 %v324_v7  ;;  %v334_v13 = vmul.f32 1.442695, %v304_v9  ;;  %v266_v14 = vmul.f32 %v483_v6, %v684_v16  ;;  %v256_v28 = vmul.f32 %v684_v16, %v200_v15 }
  0xf4   :  { %535 = vpow2.f32 %v318_v8  ;;  %v294_v17 = vsub.f32 0.0, %v745_v10  ;;  %v302_v19 = vsub.f32 0.0, %v748_v11  ;;  %v297_v20 = vsub.f32 0.0, %v751_v12 }
  0xf5   :  { %537 = vpow2.f32 %v334_v13  ;;  %v758_v22 = vadd.f32 %v689_v18, %v266_v14  ;;  %v264_v30 = vmul.f32 %v684_v16, %v232_v21  ;;  %v764_v38 = vadd.f32 %v689_v18, %v256_v28 }
  0xf6   :  { %v314_v23 = vmul.f32 1.442695, %v294_v17  ;;  %v330_v26 = vmul.f32 1.442695, %v302_v19  ;;  %v320_v27 = vmul.f32 1.442695, %v297_v20 }
  0xf7   :  { %v305_v29 = vsub.f32 0.0, %v758_v22  ;;  %v767_v44 = vadd.f32 %v689_v18, %v264_v30  ;;  %v295_v48 = vsub.f32 0.0, %v764_v38 }
  0xf8   :  { %v520_v31 = vpop.eup %519  ;;  %539 = vpow2.f32 %v314_v23 }
  0xf9   :  { %v522_v34 = vpop.eup %521  ;;  %v340_v35 = vadd.f32 1.0, %v520_v31  ;;  %541 = vpow2.f32 %v330_v26  ;;  %v336_v41 = vmul.f32 1.442695, %v305_v29  ;;  %v303_v51 = vsub.f32 0.0, %v767_v44 }
  0xfa   :  { %v524_v36 = vpop.eup %523  ;;  %v348_v37 = vadd.f32 1.0, %v522_v34  ;;  %543 = vpow2.f32 %v320_v27  ;;  %v316_v60 = vmul.f32 1.442695, %v295_v48 }
  0xfb   :  { %v526_v39 = vpop.eup %525  ;;  %545 = vrcp.f32 %v340_v35  ;;  %v338_v40 = vadd.f32 1.0, %v524_v36  ;;  %v332_v62 = vmul.f32 1.442695, %v303_v51 }
  0xfc   :  { %547 = vrcp.f32 %v348_v37  ;;  %v346_v16 = vadd.f32 1.0, %v526_v39 }
  0xfd   :  { %v528_v45 = vpop.eup %527  ;;  %549 = vrcp.f32 %v338_v40 }
  0xfe   :  { %v530_v46 = vpop.eup %529  ;;  %551 = vrcp.f32 %v346_v16  ;;  %v341_v47 = vadd.f32 1.0, %v528_v45 }
  0xff   :  { %v532_v49 = vpop.eup %531  ;;  %v349_v50 = vadd.f32 1.0, %v530_v46  ;;  %553 = vpow2.f32 %v336_v41 }
 0x100   :  { %v534_v52 = vpop.eup %533  ;;  %555 = vrcp.f32 %v341_v47  ;;  %v339_v54 = vadd.f32 1.0, %v532_v49 }
 0x101   :  { %v536_v55 = vpop.eup %535  ;;  %557 = vrcp.f32 %v349_v50  ;;  %v347_v18 = vadd.f32 1.0, %v534_v52 }
 0x102   :  { %v538_v58 = vpop.eup %537  ;;  %559 = vrcp.f32 %v339_v54  ;;  %v344_v59 = vadd.f32 1.0, %v536_v55 }
 0x103   :  { %561 = vrcp.f32 %v347_v18  ;;  %v352_v61 = vadd.f32 1.0, %v538_v58 }
 0x104   :  { %563 = vrcp.f32 %v344_v59 }
 0x105   :  { %v540_v63 = vpop.eup %539  ;;  %565 = vrcp.f32 %v352_v61 }
 0x106   :  { %v542_v0 = vpop.eup %541  ;;  %v342_v2 = vadd.f32 1.0, %v540_v63  ;;  %567 = vpow2.f32 %v316_v60 }
 0x107   :  { %v544_v3 = vpop.eup %543  ;;  %v350_v4 = vadd.f32 1.0, %v542_v0  ;;  %569 = vpow2.f32 %v332_v62 }
 0x108   :  { %v546_v5 = vpop.eup %545  ;;  %571 = vrcp.f32 %v342_v2  ;;  %v345_v6 = vadd.f32 1.0, %v544_v3 }
 0x109   :  { %v548_v7 = vpop.eup %547  ;;  %v372_v8 = vmul.f32 %v546_v5, %v694_v24  ;;  %573 = vrcp.f32 %v350_v4 }
 0x10a   :  { %v550_v9 = vpop.eup %549  ;;  %v380_v13 = vmul.f32 %v548_v7, %v697_v25  ;;  %575 = vrcp.f32 %v345_v6 }
 0x10b   :  { %v552_v14 = vpop.eup %551  ;;  %388 = vst [vmem:[#allocation2 + $0x10] sm:$0xff] %v372_v8  ;;  %v370_v15 = vmul.f32 %v550_v9, %v704_v32 }
 0x10c   :  { %v554_v17 = vpop.eup %553  ;;  %396 = vst [vmem:[#allocation2 + $0x50] sm:$0xff] %v380_v13  ;;  %v378_v19 = vmul.f32 %v552_v14, %v707_v33 }
 0x10d   :  { %v556_v20 = vpop.eup %555  ;;  %386 = vst [vmem:[#allocation2] sm:$0xff] %v370_v15  ;;  %v353_v21 = vadd.f32 1.0, %v554_v17 }
 0x10e   :  { %v558_v23 = vpop.eup %557  ;;  %394 = vst [vmem:[#allocation2 + $0x40] sm:$0xff] %v378_v19  ;;  %v373_v24 = vmul.f32 %v556_v20, %v714_v42 }
 0x10f   :  { %v560_v26 = vpop.eup %559  ;;  %v381_v27 = vmul.f32 %v558_v23, %v717_v43  ;;  %577 = vrcp.f32 %v353_v21 }
 0x110   :  { %v562_v25 = vpop.eup %561  ;;  %389 = vst [vmem:[#allocation2 + $0x18] sm:$0xff] %v373_v24  ;;  %v371_v28 = vmul.f32 %v560_v26, %v725_v53 }
 0x111   :  { %v564_v32 = vpop.eup %563  ;;  %397 = vst [vmem:[#allocation2 + $0x58] sm:$0xff] %v381_v27  ;;  %v379_v29 = vmul.f32 %v562_v25, %v728_v56 }
 0x112   :  { %v566_v33 = vpop.eup %565  ;;  %387 = vst [vmem:[#allocation2 + $0x8] sm:$0xff] %v371_v28  ;;  %v376_v30 = vmul.f32 %v564_v32, %v731_v57 }
 0x113   :  { %v568_v31 = vpop.eup %567  ;;  %395 = vst [vmem:[#allocation2 + $0x48] sm:$0xff] %v379_v29  ;;  %v384_v42 = vmul.f32 %v566_v33, %v738_v1 }
 0x114   :  { %v570_v34 = vpop.eup %569  ;;  %392 = vst [vmem:[#allocation2 + $0x30] sm:$0xff] %v376_v30  ;;  %v343_v43 = vadd.f32 1.0, %v568_v31 }
 0x115   :  { %v572_v35 = vpop.eup %571  ;;  %400 = vst [vmem:[#allocation2 + $0x70] sm:$0xff] %v384_v42  ;;  %v351_v36 = vadd.f32 1.0, %v570_v34 }
 0x116   :  { %v574_v37 = vpop.eup %573  ;;  %v374_v53 = vmul.f32 %v572_v35, %v745_v10  ;;  %579 = vrcp.f32 %v343_v43 }
 0x117   :  { %v576_v39 = vpop.eup %575  ;;  %v382_v56 = vmul.f32 %v574_v37, %v748_v11  ;;  %581 = vrcp.f32 %v351_v36 }
 0x118   :  { %390 = vst [vmem:[#allocation2 + $0x20] sm:$0xff] %v374_v53  ;;  %v377_v57 = vmul.f32 %v576_v39, %v751_v12 }
 0x119   :  { %398 = vst [vmem:[#allocation2 + $0x60] sm:$0xff] %v382_v56 }
 0x11a   :  { %393 = vst [vmem:[#allocation2 + $0x38] sm:$0xff] %v377_v57 }
 0x11c   :  { %v578_v1 = vpop.eup %577 }
 0x11d   :  { %v385_v40 = vmul.f32 %v578_v1, %v758_v22 }
 0x11f   :  { %401 = vst [vmem:[#allocation2 + $0x78] sm:$0xff] %v385_v40 }
 0x123   :  { %v580_v41 = vpop.eup %579 }
 0x124   :  { %v582_v16 = vpop.eup %581  ;;  %v375_v10 = vmul.f32 %v580_v41, %v764_v38 }
 0x125   :  { %v383_v45 = vmul.f32 %v582_v16, %v767_v44 }
 0x126   :  { %391 = vst [vmem:[#allocation2 + $0x28] sm:$0xff] %v375_v10 }
 0x127   :  { %399 = vst [vmem:[#allocation2 + $0x68] sm:$0xff] %v383_v45 }
 0x128   :  { %594 = shalt.err (!%p591_p4)
}
 0x129   :  { %s606_s24 = smov 128   ;;  %s607_s25 = smov 8  }
 0x12a   :  { %413 = dma.vmem_to_hbm [thread:$0]  %s408_s2, 2048, %s794_s4, [#allocation3], %s606_s24, %s606_s24, %s607_s25  }
 0x12b   :  { %603 = dma.done.wait [#allocation3], 2048  }
 0x12c   :  { %604 = vsyncadd [#allocation3], 4294965248 }
 0x12d   :  { %417 = vsyncpa [#allocation3], 1 }

</bundles_post_ra>
